<compile_context>
chip_gen: v6e
topology: v6e:2x2x1
jax: 0.10.0
libtpu: 0.0.40
codegen_flags: <defaults>
</compile_context>

<pallas_src>
import functools

import jax
import jax.numpy as jnp
from jax import lax
from jax.experimental import pallas as pl
from jax.experimental.pallas import tpu as pltpu


def _round_up(x, m):
    return (x + m - 1) // m * m


def _bigram_kernel(tok_ref, tgt_ref, hi_ref, lo_ref, lo2_ref,
                   logits_ref, loss_ref, *, tn, rc, n_cols, n_valid,
                   mask_rows):
    """One grid step handles `tn` rows of the flattened (B*T) batch.

    tok_ref, tgt_ref : VMEM (tn, 1) int32 token / target blocks
    hi/lo/lo2_ref    : VMEM (V_pad, C_pad) bf16, resident across the grid;
                       hi + lo + lo2 == f32 embedding table (3-way split)
    logits_ref       : VMEM (tn, C_pad) f32 output tile
    loss_ref         : VMEM (1, 8, 128) f32 per-tile partial loss block
    """
    i = pl.program_id(0)
    base = i * tn
    v_pad = hi_ref.shape[0]
    c_pad = hi_ref.shape[1]

    class_ids = lax.broadcasted_iota(jnp.int32, (1, v_pad), 1)
    col_ids = lax.broadcasted_iota(jnp.int32, (1, c_pad), 1)

    tile_loss = jnp.float32(0.0)
    # Static Python chunk loop: each chunk does one dense vectorized gather,
    # one dense full-tile store and its lse, so vreg pressure stays bounded.
    for r0 in range(0, tn, rc):
        cur = min(rc, tn - r0)
        tok = tok_ref[pl.ds(r0, cur), :]            # (cur, 1) int32
        tgt = tgt_ref[pl.ds(r0, cur), :]            # (cur, 1) int32

        # Vectorized row gather as a one-hot matmul on the MXU.  The one-hot
        # is exact in bf16; summing the three bf16 table terms reconstructs
        # the f32 table, so the gathered logits are (near-)exact f32.
        onehot = (tok == class_ids).astype(jnp.bfloat16)        # (cur, v_pad)
        chunk = jnp.dot(onehot, hi_ref[...],
                        preferred_element_type=jnp.float32)
        chunk = chunk + jnp.dot(onehot, lo_ref[...],
                                preferred_element_type=jnp.float32)
        chunk = chunk + jnp.dot(onehot, lo2_ref[...],
                                preferred_element_type=jnp.float32)

        logits_ref[pl.ds(r0, cur), :] = chunk       # dense full-vreg store

        # Cross-entropy pieces, consuming the freshly computed chunk (no
        # round-trip back through logits_ref).
        if n_cols != c_pad:
            smax_in = jnp.where(col_ids < n_cols, chunk, -1e30)
        else:
            smax_in = chunk
        m = jnp.max(smax_in, axis=-1, keepdims=True)            # (cur, 1)
        lse = m + jnp.log(jnp.sum(jnp.exp(smax_in - m), axis=-1,
                                  keepdims=True))
        corr = jnp.sum(jnp.where(tgt == col_ids, chunk, 0.0),
                       axis=-1, keepdims=True)                  # (cur, 1)
        per_row = lse - corr
        if mask_rows:
            rows = base + r0 + lax.broadcasted_iota(jnp.int32, (cur, 1), 0)
            per_row = jnp.where(rows < n_valid, per_row, 0.0)
        tile_loss = tile_loss + jnp.sum(per_row)

    loss_ref[...] = jnp.full(loss_ref.shape, tile_loss, jnp.float32)


def bigram_forward(idx, targets, table, *, tn_max=1024, rc=256):
    """idx, targets: (B, T) int; table: (V, C) f32 with C == V.

    Returns (logits of shape (B*T, C), scalar mean cross-entropy loss),
    matching the PyTorch forward when targets are provided.
    """
    B, T = idx.shape
    V, C = table.shape
    N = B * T

    if targets is None:
        # Match PyTorch: loss = 0, logits un-flattened.
        logits, _ = bigram_forward(idx, jnp.zeros((B, T), jnp.int32), table,
                                   tn_max=tn_max, rc=rc)
        return logits.reshape(B, T, C), jnp.float32(0.0)

    # --- padding / tiling ---------------------------------------------------
    V_pad = _round_up(V, 128)                 # MXU contraction dim
    C_pad = _round_up(C, 128)                 # lane-dense logits tiles

    N8 = _round_up(N, 8)
    if N8 <= tn_max:
        # Small problems: keep N_pad == N (avoid the padded-slice copy) and
        # try to split into 2 tiles so both v7x TensorCores get work.
        TN = N8 // 2 if (N8 >= 16 and N8 % 16 == 0) else N8
    else:
        TN = tn_max
    N_pad = _round_up(N, TN)
    num_tiles = N_pad // TN
    rc = min(rc, TN)

    idx_col = jnp.pad(idx.reshape(-1).astype(jnp.int32),
                      (0, N_pad - N)).reshape(N_pad, 1)
    tgt_col = jnp.pad(targets.reshape(-1).astype(jnp.int32),
                      (0, N_pad - N)).reshape(N_pad, 1)

    # 3-way bf16 split of the f32 table: hi + lo + lo2 == table (to <1e-7
    # relative), so the 0/1 one-hot MXU gather reproduces exact f32 logits.
    t32 = table.astype(jnp.float32)
    t_hi = t32.astype(jnp.bfloat16)
    r1 = t32 - t_hi.astype(jnp.float32)
    t_lo = r1.astype(jnp.bfloat16)
    r2 = r1 - t_lo.astype(jnp.float32)
    t_lo2 = r2.astype(jnp.bfloat16)

    def pad_tab(t):
        if V_pad != V or C_pad != C:
            t = jnp.pad(t, ((0, V_pad - V), (0, C_pad - C)))
        return t

    t_hi, t_lo, t_lo2 = pad_tab(t_hi), pad_tab(t_lo), pad_tab(t_lo2)

    # Resident table blocks (constant index map -> fetched once).
    tab_spec = pl.BlockSpec((V_pad, C_pad), lambda i: (0, 0))

    grid_spec = pltpu.PrefetchScalarGridSpec(
        num_scalar_prefetch=0,
        grid=(num_tiles,),
        in_specs=[
            pl.BlockSpec((TN, 1), lambda i: (i, 0)),     # tokens
            pl.BlockSpec((TN, 1), lambda i: (i, 0)),     # targets
            tab_spec, tab_spec, tab_spec,                # bf16 table parts
        ],
        out_specs=[
            pl.BlockSpec((TN, C_pad), lambda i: (i, 0)),
            pl.BlockSpec((1, 8, 128), lambda i: (i, 0, 0)),
        ],
    )

    cost = pl.CostEstimate(
        flops=2 * 3 * N_pad * V_pad * C_pad + 6 * N_pad * C_pad,
        transcendentals=N_pad * C_pad + N_pad,
        bytes_accessed=(N_pad * C_pad * 4            # logits writeback
                        + 3 * V_pad * C_pad * 2      # bf16 tables
                        + 2 * N_pad * 4              # tokens + targets
                        + num_tiles * 8 * 128 * 4),  # loss partials
    )

    logits_p, loss_parts = pl.pallas_call(
        functools.partial(_bigram_kernel, tn=TN, rc=rc, n_cols=C,
                          n_valid=N, mask_rows=(N_pad != N)),
        grid_spec=grid_spec,
        out_shape=(
            jax.ShapeDtypeStruct((N_pad, C_pad), jnp.float32),
            jax.ShapeDtypeStruct((num_tiles, 8, 128), jnp.float32),
        ),
        compiler_params=pltpu.CompilerParams(
            dimension_semantics=("parallel",)),      # shard tiles across TCs
        cost_estimate=cost,
    )(idx_col, tgt_col, t_hi, t_lo, t_lo2)

    # Slice only when padding was actually added (otherwise it's a no-op and
    # the logits writeback stays single-pass HBM traffic).
    logits = logits_p
    if N_pad != N or C_pad != C:
        logits = logits_p[:N, :C]
    loss = jnp.sum(loss_parts[:, 0, 0]) / jnp.float32(N)
    return logits, loss


def _reference_forward(idx, targets, table):
    B, T = idx.shape
    logits = table[idx].reshape(B * T, -1)
    tgt = targets.reshape(-1)
    lse = jax.nn.logsumexp(logits, axis=-1)
    correct = jnp.take_along_axis(logits, tgt[:, None], axis=-1)[:, 0]
    return logits, jnp.mean(lse - correct)


if __name__ == "__main__":
    # Small deterministic problem: vocab=128, batch=2, seq=8.
    V = 128
    B, T = 2, 8
    key = jax.random.PRNGKey(0)
    k_table, k_idx, k_tgt = jax.random.split(key, 3)

    # nn.Embedding(vocab_size, vocab_size) weight ~ N(0, 1).
    table = jax.random.normal(k_table, (V, V), dtype=jnp.float32)
    idx = jax.random.randint(k_idx, (B, T), 0, V, dtype=jnp.int32)
    targets = jax.random.randint(k_tgt, (B, T), 0, V, dtype=jnp.int32)

    logits, loss = bigram_forward(idx, targets, table)
    jax.block_until_ready((logits, loss))

    ref_logits, ref_loss = _reference_forward(idx, targets, table)
    assert logits.shape == (B * T, V)
    assert jnp.allclose(logits, ref_logits, atol=1e-5, rtol=1e-5)
    assert jnp.allclose(loss, ref_loss, atol=1e-5, rtol=1e-5)

    print("KERNEL_OK")
</pallas_src>

<mosaic_0001>
module attributes {stable_mosaic.version = 11 : i64} {
  func.func @_bigram_kernel(%arg0: i32, %arg1: memref<8x1xi32, #tpu.memory_space<vmem>>, %arg2: memref<8x1xi32, #tpu.memory_space<vmem>>, %arg3: memref<128x128xbf16, #tpu.memory_space<vmem>>, %arg4: memref<128x128xbf16, #tpu.memory_space<vmem>>, %arg5: memref<128x128xbf16, #tpu.memory_space<vmem>>, %arg6: memref<8x128xf32, #tpu.memory_space<vmem>>, %arg7: memref<1x8x128xf32, #tpu.memory_space<vmem>>) attributes {dimension_semantics = [#tpu.dimension_semantics<parallel>], iteration_bounds = array<i64: 2>, scalar_prefetch = 0 : i64, scratch_operands = 0 : i64, tpu.core_type = #tpu.core_type<tc>, window_params = [{transform_indices = @transform_0, window_bounds = array<i64: 8, 1>}, {transform_indices = @transform_1, window_bounds = array<i64: 8, 1>}, {pipeline_mode = #tpu.pipeline_mode<synchronous>, transform_indices = @transform_2, window_bounds = array<i64: 128, 128>}, {pipeline_mode = #tpu.pipeline_mode<synchronous>, transform_indices = @transform_3, window_bounds = array<i64: 128, 128>}, {pipeline_mode = #tpu.pipeline_mode<synchronous>, transform_indices = @transform_4, window_bounds = array<i64: 128, 128>}, {transform_indices = @transform_5, window_bounds = array<i64: 8, 128>}, {transform_indices = @transform_6, window_bounds = array<i64: 1, 8, 128>}]} {
    %0 = tpu.iota {dimensions = array<i32: 1>} : vector<1x128xi32>
    %1 = tpu.iota {dimensions = array<i32: 1>} : vector<1x128xi32>
    %c0 = arith.constant 0 : index
    %c0_0 = arith.constant 0 : index
    %2 = vector.load %arg1[%c0, %c0_0] : memref<8x1xi32, #tpu.memory_space<vmem>>, vector<8x1xi32>
    %c0_1 = arith.constant 0 : index
    %c0_2 = arith.constant 0 : index
    %3 = vector.load %arg2[%c0_1, %c0_2] : memref<8x1xi32, #tpu.memory_space<vmem>>, vector<8x1xi32>
    %4 = vector.broadcast %2 : vector<8x1xi32> to vector<8x128xi32>
    %5 = vector.broadcast %0 : vector<1x128xi32> to vector<8x128xi32>
    %6 = arith.cmpi eq, %4, %5 : vector<8x128xi32>
    %7 = arith.extui %6 : vector<8x128xi1> to vector<8x128xi32>
    %8 = arith.sitofp %7 : vector<8x128xi32> to vector<8x128xf32>
    %9 = arith.truncf %8 : vector<8x128xf32> to vector<8x128xbf16>
    %c0_3 = arith.constant 0 : index
    %c0_4 = arith.constant 0 : index
    %10 = vector.load %arg3[%c0_3, %c0_4] : memref<128x128xbf16, #tpu.memory_space<vmem>>, vector<128x128xbf16>
    %cst = arith.constant dense<0.000000e+00> : vector<8x128xf32>
    %11 = tpu.matmul %9, %10, %cst {dimension_numbers = #tpu.dot_dimension_numbers<[1], [0], [0], [1], [0, 0, 1, 1], [], []>} : vector<8x128xbf16>, vector<128x128xbf16>, vector<8x128xf32> -> vector<8x128xf32>
    %c0_5 = arith.constant 0 : index
    %c0_6 = arith.constant 0 : index
    %12 = vector.load %arg4[%c0_5, %c0_6] : memref<128x128xbf16, #tpu.memory_space<vmem>>, vector<128x128xbf16>
    %cst_7 = arith.constant dense<0.000000e+00> : vector<8x128xf32>
    %13 = tpu.matmul %9, %12, %cst_7 {dimension_numbers = #tpu.dot_dimension_numbers<[1], [0], [0], [1], [0, 0, 1, 1], [], []>} : vector<8x128xbf16>, vector<128x128xbf16>, vector<8x128xf32> -> vector<8x128xf32>
    %14 = arith.addf %11, %13 : vector<8x128xf32>
    %c0_8 = arith.constant 0 : index
    %c0_9 = arith.constant 0 : index
    %15 = vector.load %arg5[%c0_8, %c0_9] : memref<128x128xbf16, #tpu.memory_space<vmem>>, vector<128x128xbf16>
    %cst_10 = arith.constant dense<0.000000e+00> : vector<8x128xf32>
    %16 = tpu.matmul %9, %15, %cst_10 {dimension_numbers = #tpu.dot_dimension_numbers<[1], [0], [0], [1], [0, 0, 1, 1], [], []>} : vector<8x128xbf16>, vector<128x128xbf16>, vector<8x128xf32> -> vector<8x128xf32>
    %17 = arith.addf %14, %16 : vector<8x128xf32>
    %c0_11 = arith.constant 0 : index
    %c0_12 = arith.constant 0 : index
    %18 = vector.load %arg6[%c0_11, %c0_12] : memref<8x128xf32, #tpu.memory_space<vmem>>, vector<8x128xf32>
    tpu.vector_store %arg6[%c0_11, %c0_12], %17 {strides = array<i32>} : memref<8x128xf32, #tpu.memory_space<vmem>>, vector<8x128xf32>,
    %cst_13 = arith.constant dense<0xFF800000> : vector<8xf32>
    %19 = vector.multi_reduction <maximumf>, %17, %cst_13 [1] : vector<8x128xf32> to vector<8xf32>
    %20 = vector.shape_cast %19 : vector<8xf32> to vector<8x1xf32>
    %21 = vector.broadcast %20 : vector<8x1xf32> to vector<8x128xf32>
    %22 = arith.subf %17, %21 : vector<8x128xf32>
    %23 = math.exp %22 : vector<8x128xf32>
    %cst_14 = arith.constant dense<0.000000e+00> : vector<8xf32>
    %24 = vector.multi_reduction <add>, %23, %cst_14 [1] : vector<8x128xf32> to vector<8xf32>
    %25 = vector.shape_cast %24 : vector<8xf32> to vector<8x1xf32>
    %26 = math.log %25 : vector<8x1xf32>
    %27 = arith.addf %20, %26 : vector<8x1xf32>
    %28 = vector.broadcast %3 : vector<8x1xi32> to vector<8x128xi32>
    %29 = vector.broadcast %1 : vector<1x128xi32> to vector<8x128xi32>
    %30 = arith.cmpi eq, %28, %29 : vector<8x128xi32>
    %cst_15 = arith.constant 0.000000e+00 : f32
    %31 = vector.broadcast %cst_15 : f32 to vector<8x128xf32>
    %32 = arith.select %30, %17, %31 : vector<8x128xi1>, vector<8x128xf32>
    %cst_16 = arith.constant dense<0.000000e+00> : vector<8xf32>
    %33 = vector.multi_reduction <add>, %32, %cst_16 [1] : vector<8x128xf32> to vector<8xf32>
    %34 = vector.shape_cast %33 : vector<8xf32> to vector<8x1xf32>
    %35 = arith.subf %27, %34 : vector<8x1xf32>
    %36 = vector.shape_cast %35 : vector<8x1xf32> to vector<1x8x1xf32>
    %cst_17 = arith.constant dense<0.000000e+00> : vector<1xf32>
    %37 = vector.multi_reduction <add>, %36, %cst_17 [1, 2] : vector<1x8x1xf32> to vector<1xf32>
    %38 = vector.shape_cast %37 : vector<1xf32> to vector<1x1x1xf32>
    %39 = vector.extract %38[0, 0, 0] : f32 from vector<1x1x1xf32>
    %cst_18 = arith.constant 0.000000e+00 : f32
    %40 = arith.addf %cst_18, %39 : f32
    %41 = vector.broadcast %40 : f32 to vector<1x8x128xf32>
    %c0_19 = arith.constant 0 : index
    %c0_20 = arith.constant 0 : index
    %c0_21 = arith.constant 0 : index
    %42 = vector.load %arg7[%c0_19, %c0_20, %c0_21] : memref<1x8x128xf32, #tpu.memory_space<vmem>>, vector<1x8x128xf32>
    tpu.vector_store %arg7[%c0_19, %c0_20, %c0_21], %41 {strides = array<i32>} : memref<1x8x128xf32, #tpu.memory_space<vmem>>, vector<1x8x128xf32>,
    return
  }
  func.func @transform_0(%arg0: i32) -> (i32, i32) {
    %c0_i32 = arith.constant 0 : i32
    %c0_i32_0 = arith.constant 0 : i32
    return %arg0, %c0_i32 : i32, i32
  }
  func.func @transform_1(%arg0: i32) -> (i32, i32) {
    %c0_i32 = arith.constant 0 : i32
    %c0_i32_0 = arith.constant 0 : i32
    return %arg0, %c0_i32 : i32, i32
  }
  func.func @transform_2(%arg0: i32) -> (i32, i32) {
    %c0_i32 = arith.constant 0 : i32
    %c0_i32_0 = arith.constant 0 : i32
    %c0_i32_1 = arith.constant 0 : i32
    return %c0_i32, %c0_i32_0 : i32, i32
  }
  func.func @transform_3(%arg0: i32) -> (i32, i32) {
    %c0_i32 = arith.constant 0 : i32
    %c0_i32_0 = arith.constant 0 : i32
    %c0_i32_1 = arith.constant 0 : i32
    return %c0_i32, %c0_i32_0 : i32, i32
  }
  func.func @transform_4(%arg0: i32) -> (i32, i32) {
    %c0_i32 = arith.constant 0 : i32
    %c0_i32_0 = arith.constant 0 : i32
    %c0_i32_1 = arith.constant 0 : i32
    return %c0_i32, %c0_i32_0 : i32, i32
  }
  func.func @transform_5(%arg0: i32) -> (i32, i32) {
    %c0_i32 = arith.constant 0 : i32
    %c0_i32_0 = arith.constant 0 : i32
    return %arg0, %c0_i32 : i32, i32
  }
  func.func @transform_6(%arg0: i32) -> (i32, i32, i32) {
    %c0_i32 = arith.constant 0 : i32
    %c0_i32_0 = arith.constant 0 : i32
    %c0_i32_1 = arith.constant 0 : i32
    return %arg0, %c0_i32, %c0_i32_0 : i32, i32, i32
  }
}

</mosaic_0001>

<bundles_post_ra>
// kernel: tpu_custom_call.1
= control target key start
LH: loop header
LB: loop body
LE: loop exit
PB: predicated region body
PF: predicated region fallthrough
CT: control target
= control target key end

     0   :  { %12 = vsyncpa [#allocation3], 0  ;;  %s1538_s0 = inlined_call_operand.vmem [shape: s32[16,1], index: 0, kind: input, shape index: {}]   ;;  %s1539_s1 = inlined_call_operand.vmem [shape: s32[16,1], index: 1, kind: input, shape index: {}]   ;;  %s1540_s2 = inlined_call_operand.hbm [shape: bf16[128,128], index: 2, kind: input, shape index: {}]   ;;  %s1541_s3 = inlined_call_operand.hbm [shape: bf16[128,128], index: 3, kind: input, shape index: {}]   ;;  %s1542_s4 = inlined_call_operand.hbm [shape: bf16[128,128], index: 4, kind: input, shape index: {}]   ;;  %s1543_s5 = inlined_call_operand.hbm [shape: f32[16,128], index: 5, kind: output, shape index: {0}]   ;;  %s1544_s6 = inlined_call_operand.hbm [shape: f32[2,8,128], index: 6, kind: output, shape index: {1}]  }
   0x1   :  { %13 = vsyncpa [#allocation6], 0 }
   0x2   :  { %14 = vsyncpa [#allocation4], 0 }
   0x3   :  { %16 = vsyncpa [#allocation4 + $0x1], 0 }
   0x4   :  { %17 = vsyncpa [#allocation10], 0 }
   0x5   :  { %19 = vsyncpa [#allocation10 + $0x1], 0  ;;  %s1318_s21 = smov 0   ;;  %s1320_s22 = smov 0  }
   0x6   :  { %s1322_s23 = smov 0   ;;  %s1324_s24 = smov 0  }
   0x7 LB: > { %s1339_s25 = sadd.s32 4294967295, %s1270_s24   ;;  %s843_s26 = sadd.s32 4294967294, %s1270_s24   ;;  %s1270_s24 = sphi %s1324_s24, %s1564_s24   ;;  %s1266_s23 = sphi %s1322_s23, %s1563_s23   ;;  %s1262_s22 = sphi %s1320_s22, %s1562_s22   ;;  %s1258_s21 = sphi %s1318_s21, %s1561_s21  }
   0x8   : > { %s1343_s27 = sadd.s32 1, %s1270_s24   ;;  %s147_s28 = sadd.s32 1, %s1266_s23 }
   0x9   : > { %s144_s29 = ssub.s32 %s1270_s24, %s1343_s27  ;;  %p157_p0 = scmp.ne.s32.totalorder %s1266_s23, %s1262_s22 }
   0xa   : > { %p145_p1 = scmp.eq.s32.totalorder %s144_s29, 0  ;;  %p158_p2 = scmp.eq.s32.totalorder %s1339_s25, 1 }
   0xb   : > { %p163_p3 = scmp.ne.s32.totalorder %s1262_s22, %s1258_s21  ;;  %p164_p4 = scmp.eq.s32.totalorder %s843_s26, 1 }
   0xc   : > { %s1354_s30 = scalar_select %p145_p1, %s1266_s23, %s147_s28  }
   0xd   : > { %p1356_p5 = por %p158_p2, %p157_p0  ;;  %p1360_p6 = por %p164_p4, %p163_p3 }
   0xe   : > { %p844_p7 = scmp.ge.s32.totalorder %s1270_s24, 1  ;;  %p197_p8 = scmp.lt.s32.totalorder %s1270_s24, 3 }
   0xf   : > { %s1548_s7 = scalar_select %p1356_p5, 1, 0 }
  0x10   : > { %s1549_s8 = scalar_select %p1360_p6, 1, 0 }
  0x11   : > { %p1545_p9 = scmp.eq.s32.totalorder %s1339_s25, 0  ;;  %p1367_p10 = pnand %p844_p7, %p197_p8 }
  0x12   : > { %s1272_s10 = smov [#allocation5]   ;;  %s1273_s13 = smov [#allocation2]  }
  0x13   : > { %p999_p11 = pneg %p1367_p10  ;;  %s222_s11 = sshll.u32 %s1272_s10, 4  ;;  %s223_s11 = int_to_ptr.vmem [resolvable:$true] %s222_s11 }
  0x14   : > { %s209_s14 = sshll.u32 %s1273_s13, 4  ;;  %s1274_s15 = smov [#allocation7]   ;;  %s210_s14 = int_to_ptr.vmem [resolvable:$true] %s209_s14 }
  0x15   : > { %p1375_p12 = pnand %p1545_p9, %p999_p11  ;;  %s235_s16 = sshll.u32 %s1274_s15, 4  ;;  %s236_s16 = int_to_ptr.vmem [resolvable:$true] %s235_s16 }
  0x16   : > { %s1105_s17 = scalar_lea.vmem %s223_s11, 1024  ;;  %p1113_p3 = scmp.lt.s32.totalorder %s223_s11, %s223_s11 }
  0x17   : > { %p1096_p13 = pneg %p1375_p12  ;;  %p1106_p0 = scmp.ne.s32.totalorder %s223_s11, %s1105_s17 }
  0x18   : > { %p1114_p4 = scmp.lt.s32.totalorder %s1105_s17, %s1105_s17 }
  0x19   : > { %p1108_p1 = pnand %p1106_p0, %p1096_p13 }
  0x1a   : > { %p1115_p7 = por %p1114_p4, %p1113_p3 }
  0x1b   : > { %p1109_p2 = pneg %p1108_p1 }
  0x1d   : > { %p1116_p8 = pnand %p1115_p7, %p1109_p2 }
  0x1f   : > { %1119 = shalt.err (!%p1116_p8)
}
  0x20   : > { %s1275_s18 = smov 64   ;;  %s1276_s19 = smov 4  }
  0x21   : > { %1005 = dma.hbm_to_vmem [thread:$0]  (!%p1375_p12), %s1541_s3, 1024, %s223_s11, [#allocation6], %s1275_s18, %s1275_s18, %s1276_s19  }
  0x22   : > { %s1131_s28 = scalar_lea.vmem %s210_s14, 1024  ;;  %p1139_p9 = scmp.lt.s32.totalorder %s210_s14, %s210_s14 }
  0x23   : > { %p1132_p11 = scmp.ne.s32.totalorder %s210_s14, %s1131_s28  ;;  %p1140_p6 = scmp.lt.s32.totalorder %s1131_s28, %s1131_s28 }
  0x25   : > { %p1134_p0 = pnand %p1132_p11, %p1096_p13  ;;  %p1141_p3 = por %p1140_p6, %p1139_p9 }
  0x27   : > { %p1135_p1 = pneg %p1134_p0 }
  0x29   : > { %p1142_p2 = pnand %p1141_p3, %p1135_p1 }
  0x2b   : > { %1145 = shalt.err (!%p1142_p2)
}
  0x2c   : > { %1002 = dma.hbm_to_vmem [thread:$0]  (!%p1375_p12), %s1540_s2, 1024, %s210_s14, [#allocation3], %s1275_s18, %s1275_s18, %s1276_s19  }
  0x2d   : > { %s1157_s11 = scalar_lea.vmem %s236_s16, 1024  ;;  %p1165_p11 = scmp.lt.s32.totalorder %s236_s16, %s236_s16 }
  0x2e   : > { %p1158_p4 = scmp.ne.s32.totalorder %s236_s16, %s1157_s11  ;;  %p1166_p0 = scmp.lt.s32.totalorder %s1157_s11, %s1157_s11 }
  0x30   : > { %p1160_p7 = pnand %p1158_p4, %p1096_p13  ;;  %p1167_p5 = por %p1166_p0, %p1165_p11 }
  0x32   : > { %p1161_p8 = pneg %p1160_p7 }
  0x34   : > { %p1168_p6 = pnand %p1167_p5, %p1161_p8 }
  0x36   : > { %1171 = shalt.err (!%p1168_p6)
}
  0x37   : > { %1008 = dma.hbm_to_vmem [thread:$0]  (!%p1375_p12), %s1542_s4, 1024, %s236_s16, [#allocation6], %s1275_s18, %s1275_s18, %s1276_s19  }
  0x38   : > { %265 = sbr.rel (%p1367_p10) target bundleno = 954 (0x3ba), region = 40  ;;  %p1552_p9 = scmp.eq.s32.totalorder (!%p1367_p10), %s1339_s25, 0 }
  0x3d   : > { %1241 = dma.done.wait (%p1552_p9), [#allocation3], 1024   ;;  %p1553_p13 = pmov %p1552_p9 }
  0x3e   : > { %p1554_p1 = pmov %p1552_p9 }
  0x3f   : > { %1243 = vsyncadd (%p1553_p13), [#allocation3], 4294966272 }
  0x40   : > { %1245 = dma.done.wait (%p1554_p1), [#allocation6], 2048   ;;  %p1555_p5 = pmov %p1554_p1 }
  0x41   : > { %p311_p3 = scmp.lt.s32.totalorder %s1339_s25, 1  ;;  %v1277_v0 = vmov 0   ;;  %v1278_v1 = vmov 0.0   ;;  %vm1279_vm0 = vmmov 0   ;;  %v1066_v3 = vld [vmem:[#allocation5 + $0x38] sm:$0xff]   ;;  %v1068_v5 = vld [vmem:[#allocation5 + $0x30] sm:$0xff]   ;;  %v320_v20 = vlaneseq }
  0x42   : > { %1247 = vsyncadd (%p1555_p5), [#allocation6], 4294965248  ;;  %1064 = vset.pattern.permute.xlu0 %v1277_v0  ;;  %921 = vmatprep.subr.bf16.mxu0 %v1278_v1  ;;  %v1067_v4 = vld [vmem:[#allocation2 + $0x38] sm:$0xff]   ;;  %v1069_v6 = vld [vmem:[#allocation2 + $0x30] sm:$0xff]   ;;  %v1280_v25 = vmov 1.0|1.0  }
  0x43   : > { %s1418_s9 = scalar_select %p311_p3, %s1339_s25, 1  ;;  %941 = vmatprep.subr.bf16.mxu1 %v1278_v1  ;;  %1065 = vset.pattern.permute.xlu1 %v1277_v0  ;;  %v1070_v7 = vld [vmem:[#allocation5 + $0x28] sm:$0xff]   ;;  %v1072_v9 = vld [vmem:[#allocation5 + $0x20] sm:$0xff]   ;;  %v1074_v11 = vld [vmem:[#allocation5 + $0x18] sm:$0xff]   ;;  %v321_v21 = vand.u32 127, %v320_v20  ;;  %vm663_vm4 = vcmask 7168  }
  0x44   : > { %937 = vmatprep.mubr.msk.bf16.mxu0 %vm1279_vm0, %v1278_v1  ;;  %957 = vmatprep.mubr.msk.bf16.mxu1 %vm1279_vm0, %v1278_v1  ;;  %v1071_v8 = vld [vmem:[#allocation2 + $0x28] sm:$0xff]   ;;  %v1073_v10 = vld [vmem:[#allocation2 + $0x20] sm:$0xff]   ;;  %v1075_v12 = vld [vmem:[#allocation2 + $0x18] sm:$0xff]   ;;  %s1471_s26 = sand.u32 1, %s1262_s22   ;;  %s1547_s10 = sshll.u32 %s1339_s25, 7 }
  0x45   : > { %s855_s12 = sshll.u32 %s1418_s9, 3  ;;  %922 = vmatpush3.bf16.msra.mxu0 %v1066_v3  ;;  %942 = vmatpush3.bf16.msra.mxu1 %v1067_v4  ;;  %v1076_v13 = vld [vmem:[#allocation5 + $0x10] sm:$0xff]   ;;  %v1078_v15 = vld [vmem:[#allocation5 + $0x8] sm:$0xff]   ;;  %v1080_v17 = vld [vmem:[#allocation5] sm:$0xff]   ;;  %s853_s28 = sshll.u32 %s1471_s26, 3 }
  0x46   : > { %s314_s17 = scalar_lea.vmem %s1538_s0, %s855_s12  ;;  %923 = vmatprep.subr.bf16.mxu0 %v1278_v1  ;;  %943 = vmatprep.subr.bf16.mxu1 %v1278_v1  ;;  %v1077_v14 = vld [vmem:[#allocation2 + $0x10] sm:$0xff]   ;;  %v1079_v16 = vld [vmem:[#allocation2 + $0x8] sm:$0xff]   ;;  %v1081_v18 = vld [vmem:[#allocation2] sm:$0xff]   ;;  %s318_s20 = scalar_lea.vmem %s1539_s1, %s855_s12 }
  0x47   : > { %v322_v2 = vld [vmem:[%s314_s17] sm:$0xff]  ;;  %v1082_v23 = vld [vmem:[#allocation7 + $0x38] sm:$0xff]   ;;  %v1083_v26 = vld [vmem:[#allocation7 + $0x30] sm:$0xff]   ;;  %s303_s29 = scalar_lea.vmem [#allocation8], %s853_s28  ;;  %s694_s15 = scalar_lea.hbm %s1543_s5, %s1547_s10 }
  0x48   : > { %325 = vperm.xlu0 %1064, %v322_v2   ;;  %v323_v19 = vld [vmem:[%s318_s20] sm:$0xff]  ;;  %v1084_v27 = vld [vmem:[#allocation7 + $0x28] sm:$0xff]   ;;  %v1086_v29 = vld [vmem:[#allocation7 + $0x18] sm:$0xff]   ;;  %s696_s9 = sshll.u32 %s303_s29, 4  ;;  %s678_s12 = scalar_lea.sflag [#allocation4], %s1471_s26  ;;  %s697_s9 = int_to_ptr.vmem [resolvable:$true] %s696_s9 }
  0x49   : > { %924 = vmatpush3.bf16.msra.mxu0 %v1068_v5  ;;  %944 = vmatpush3.bf16.msra.mxu1 %v1069_v6  ;;  %v1085_v28 = vld [vmem:[#allocation7 + $0x20] sm:$0xff]   ;;  %v1087_v30 = vld [vmem:[#allocation7 + $0x10] sm:$0xff]   ;;  %v1088_v31 = vld [vmem:[#allocation7 + $0x8] sm:$0xff]   ;;  %s1172_s14 = scalar_lea.vmem %s697_s9, 128  ;;  %p1558_p12 = scmp.ne.s32.totalorder %s1548_s7, 0 }
  0x4a   : > { %925 = vmatprep.subr.bf16.mxu0 %v1278_v1  ;;  %945 = vmatprep.subr.bf16.mxu1 %v1278_v1  ;;  %v1089_v32 = vld [vmem:[#allocation7] sm:$0xff]   ;;  %p1173_p10 = scmp.ne.s32.totalorder %s697_s9, %s1172_s14  ;;  %s1281_s16 = smov [#allocation8]  }
  0x4b   : > { %656 = vperm.xlu1 %1065, %v323_v19   ;;  %s1176_s17 = sshll.u32 %s1281_s16, 4  ;;  %s1177_s17 = int_to_ptr.vmem [resolvable:$false] %s1176_s17 }
  0x4c   : > { %p1174_p2 = pnand %p1173_p10, %p1558_p12  ;;  %s1178_s18 = scalar_lea.vmem %s1177_s17, 256 }
  0x4d   : > { %926 = vmatpush3.bf16.msra.mxu0 %v1070_v7  ;;  %946 = vmatpush3.bf16.msra.mxu1 %v1071_v8  ;;  %p1179_p7 = scmp.lt.s32.totalorder %s697_s9, %s1177_s17  ;;  %p1180_p8 = scmp.lt.s32.totalorder %s1178_s18, %s1172_s14 }
  0x4e   : > { %927 = vmatprep.subr.bf16.mxu0 %v1278_v1  ;;  %947 = vmatprep.subr.bf16.mxu1 %v1278_v1  ;;  %p1175_p4 = pneg %p1174_p2 }
  0x4f   : > { %p1181_p11 = por %p1180_p8, %p1179_p7 }
  0x51   : > { %928 = vmatpush3.bf16.msra.mxu0 %v1072_v9  ;;  %948 = vmatpush3.bf16.msra.mxu1 %v1073_v10  ;;  %p1182_p0 = pnand %p1181_p11, %p1175_p4 }
  0x52   : > { %929 = vmatprep.subr.bf16.mxu0 %v1278_v1  ;;  %949 = vmatprep.subr.bf16.mxu1 %v1278_v1 }
  0x55   : > { %930 = vmatpush3.bf16.msra.mxu0 %v1074_v11  ;;  %950 = vmatpush3.bf16.msra.mxu1 %v1075_v12 }
  0x56   : > { %931 = vmatprep.subr.bf16.mxu0 %v1278_v1  ;;  %951 = vmatprep.subr.bf16.mxu1 %v1278_v1 }
  0x59   : > { %932 = vmatpush3.bf16.msra.mxu0 %v1076_v13  ;;  %952 = vmatpush3.bf16.msra.mxu1 %v1077_v14 }
  0x5a   : > { %933 = vmatprep.subr.bf16.mxu0 %v1278_v1  ;;  %953 = vmatprep.subr.bf16.mxu1 %v1278_v1 }
  0x5d   : > { %934 = vmatpush3.bf16.msra.mxu0 %v1078_v15  ;;  %954 = vmatpush3.bf16.msra.mxu1 %v1079_v16 }
  0x5e   : > { %935 = vmatprep.subr.bf16.mxu0 %v1278_v1  ;;  %955 = vmatprep.subr.bf16.mxu1 %v1278_v1 }
  0x61   : > { %936 = vmatpush3.bf16.msra.mxu0 %v1080_v17  ;;  %956 = vmatpush3.bf16.msra.mxu1 %v1081_v18 }
  0x62   : > { %961 = vmatprep.subr.bf16.mxu0 %v1278_v1 }
  0xc3   : > { %v326_v22 = vpop.permute.xlu0 %325 }
  0xc4   : > { %vm327_vm1 = vcmp.eq.s32.totalorder %v326_v22, %v321_v21 }
  0xc5   : > { %vm1451_vm2 = vmpackc.low %vm327_vm1, %vm327_vm1 }
  0xc6   : > { %938 = vmatmul.mubr.msk.bf16.vlgmr.msra.gmra.mxu0 %vm1451_vm2, %v1280_v25  ;;  %958 = vmatmul.mubr.msk.bf16.vlgmr.msra.gmra.mxu1 %vm1451_vm2, %v1280_v25  ;;  %v657_v43 = vpop.permute.xlu1 %656 }
  0xc7   : > { %962 = vmatpush3.bf16.msra.mxu0 %v1082_v23  ;;  %977 = vmatprep.mubr.msk.bf16.mxu0 %vm1279_vm0, %v1278_v1  ;;  %vm658_vm3 = vcmp.eq.s32.totalorder %v657_v43, %v321_v21 }
  0xc8   : > { %963 = vmatprep.subr.bf16.mxu0 %v1278_v1 }
  0xcb   : > { %964 = vmatpush3.bf16.msra.mxu0 %v1083_v26 }
  0xcc   : > { %965 = vmatprep.subr.bf16.mxu0 %v1278_v1 }
  0xcf   : > { %966 = vmatpush3.bf16.msra.mxu0 %v1084_v27 }
  0xd0   : > { %967 = vmatprep.subr.bf16.mxu0 %v1278_v1 }
  0xd3   : > { %968 = vmatpush3.bf16.msra.mxu0 %v1085_v28 }
  0xd4   : > { %969 = vmatprep.subr.bf16.mxu0 %v1278_v1 }
  0xd7   : > { %970 = vmatpush3.bf16.msra.mxu0 %v1086_v29 }
  0xd8   : > { %971 = vmatprep.subr.bf16.mxu0 %v1278_v1 }
  0xdb   : > { %972 = vmatpush3.bf16.msra.mxu0 %v1087_v30 }
  0xdc   : > { %973 = vmatprep.subr.bf16.mxu0 %v1278_v1 }
  0xdf   : > { %974 = vmatpush3.bf16.msra.mxu0 %v1088_v31 }
  0xe0   : > { %975 = vmatprep.subr.bf16.mxu0 %v1278_v1 }
  0xe3   : > { %976 = vmatpush3.bf16.msra.mxu0 %v1089_v32 }
  0xe6   : > { %978 = vmatmul.mubr.msk.bf16.vlgmr.msra.gmra.mxu0 %vm1451_vm2, %v1280_v25 }
 0x186   : > { %v445_v33 = vpop.f32.mrf.mxu0  ;;  %v533_v34 = vpop.f32.mrf.mxu1 }
 0x187   : > { %v534_v41 = vadd.f32 %v533_v34, %v445_v33 }
 0x188   : > { %v939_v35 = vpop.f32.mrf.mxu0  ;;  %v959_v36 = vpop.f32.mrf.mxu1 }
 0x18a   : > { %v448_v37 = vpop.f32.mrf.mxu0  ;;  %v536_v38 = vpop.f32.mrf.mxu1 }
 0x18c   : > { %v940_v39 = vpop.f32.mrf.mxu0  ;;  %v960_v40 = vpop.f32.mrf.mxu1 }
 0x1a6   : > { %v637_v42 = vpop.f32.mrf.mxu0 }
 0x1a7   : > { %v643_v44 = vadd.f32 %v637_v42, %v534_v41 }
 0x1a8   : > { %v979_v45 = vpop.f32.mrf.mxu0 }
 0x1a9   : > { %645 = vmax.xlane.f32.xlu0 %v643_v44  ;;  %644 = vst [vmem:[%s303_s29] sm:$0xff] %v643_v44  ;;  %v659_v48 = vsel %vm658_vm3, %v643_v44, 0.0 }
 0x1aa   : > { %v640_v46 = vpop.f32.mrf.mxu0 }
 0x1ac   : > { %v980_v47 = vpop.f32.mrf.mxu0 }
 0x1ad   : > { %660 = vadd.xlane.f32.xlu0 %v659_v48 }
 0x232   : > { %v646_v49 = vpop.xlane.xlu0 %645 }
 0x233   : > { %v647_v50 = vsub.f32 %v643_v44, %v646_v49 }
 0x235   : > { %v648_v51 = vmul.f32 1.442695, %v647_v50 }
 0x236   : > { %v661_v57 = vpop.xlane.xlu0 %660 }
 0x237   : > { %1090 = vpow2.f32 %v648_v51 }
 0x244   : > { %v1091_v52 = vpop.eup %1090 }
 0x245   : > { %650 = vadd.xlane.f32.xlu1 %v1091_v52 }
 0x2ce   : > { %v651_v53 = vpop.xlane.xlu1 %650 }
 0x2cf   : > { %1092 = vlog2.f32 %v651_v53 }
 0x2dc   : > { %v1093_v54 = vpop.eup %1092 }
 0x2dd   : > { %v653_v55 = vmul.f32 0.6931472, %v1093_v54 }
 0x2df   : > { %v654_v56 = vadd.f32 %v653_v55, %v646_v49 }
 0x2e1   : > { %v662_v58 = vsub.f32 %v654_v56, %v661_v57 }
 0x2e3   : > { %v664_v59 = vsel %vm663_vm4, %v662_v58, 0.0 }
 0x2e4   : > { %665 = vadd.xlane.f32.xlu0 %v664_v59 }
 0x2e5   : > { %1185 = shalt.err (!%p1182_p0)
}
 0x2e6   : > { %s1186_s19 = scalar_lea.hbm %s694_s15, 128  ;;  %s1190_s11 = scalar_lea.hbm %s1543_s5, 256 }
 0x2e7   : > { %p1187_p6 = scmp.ne.s32.totalorder %s694_s15, %s1186_s19  ;;  %p1191_p1 = scmp.lt.s32.totalorder %s694_s15, %s1543_s5 }
 0x2e8   : > { %p1192_p5 = scmp.lt.s32.totalorder %s1190_s11, %s1186_s19 }
 0x2e9   : > { %p1188_p9 = pnand %p1187_p6, %p1558_p12 }
 0x2ea   : > { %p1193_p3 = por %p1192_p5, %p1191_p1 }
 0x2eb   : > { %p1189_p13 = pneg %p1188_p9 }
 0x2ed   : > { %p1194_p10 = pnand %p1193_p3, %p1189_p13 }
 0x2ef   : > { %1197 = shalt.err (!%p1194_p10)
}
 0x2f0   : > { %995 = dma.vmem_to_hbm [thread:$0]  (%p1558_p12), %s697_s9, 128, %s694_s15, %s678_s12  }
 0x2f1   : > { %s310_s10 = scalar_lea.vmem [#allocation9], %s853_s28  ;;  %s1559_s15 = sshll.u32 %s1339_s25, 7 }
 0x2f2   : > { %s709_s14 = sshll.u32 %s310_s10, 4  ;;  %s707_s17 = scalar_lea.hbm %s1544_s6, %s1559_s15  ;;  %s1497_s14 = int_to_ptr.vmem [resolvable:$true] %s709_s14 }
 0x2f3   : > { %s683_s18 = scalar_lea.sflag [#allocation10], %s1471_s26  ;;  %s1198_s19 = scalar_lea.vmem %s1497_s14, 128 }
 0x2f4   : > { %p1199_p2 = scmp.ne.s32.totalorder %s1497_s14, %s1198_s19  ;;  %s1282_s28 = smov [#allocation9]  }
 0x2f5   : > { %s1202_s20 = sshll.u32 %s1282_s28, 4  ;;  %s1203_s20 = int_to_ptr.vmem [resolvable:$false] %s1202_s20 }
 0x2f6   : > { %p1200_p4 = pnand %p1199_p2, %p1558_p12  ;;  %s1204_s29 = scalar_lea.vmem %s1203_s20, 256 }
 0x2f7   : > { %p1205_p8 = scmp.lt.s32.totalorder %s1497_s14, %s1203_s20  ;;  %p1206_p11 = scmp.lt.s32.totalorder %s1204_s29, %s1198_s19 }
 0x2f8   : > { %p1201_p7 = pneg %p1200_p4 }
 0x2f9   : > { %p1207_p0 = por %p1206_p11, %p1205_p8 }
 0x2fb   : > { %p1208_p6 = pnand %p1207_p0, %p1201_p7 }
 0x36d   : > { %v666_v60 = vpop.xlane.xlu0 %665 }
 0x36e   : > { %v667_v61 = vrot.slane %v666_v60, 4 }
 0x370   : > { %v668_v62 = vadd.f32 %v667_v61, %v666_v60 }
 0x372   : > { %v669_v63 = vrot.slane %v668_v62, 2 }
 0x374   : > { %v670_v0 = vadd.f32 %v669_v63, %v668_v62 }
 0x376   : > { %v671_v1 = vrot.slane %v670_v0, 1 }
 0x378   : > { %v672_v2 = vadd.f32 %v671_v1, %v670_v0 }
 0x37a   : > { %981 = vpush %v672_v2 }
 0x3ab   : > { %s982_s16 = spop %981 }
 0x3ac   : > { %v675_v3 = vstv %s982_s16 }
 0x3ad   : > { %676 = vst [vmem:[%s310_s10] sm:$0xff] %v675_v3 }
 0x3ae   : > { %1211 = shalt.err (!%p1208_p6)
}
 0x3af   : > { %s1212_s25 = scalar_lea.hbm %s707_s17, 128  ;;  %s1216_s13 = scalar_lea.hbm %s1544_s6, 256 }
 0x3b0   : > { %p1213_p9 = scmp.ne.s32.totalorder %s707_s17, %s1212_s25  ;;  %p1217_p5 = scmp.lt.s32.totalorder %s707_s17, %s1544_s6 }
 0x3b1   : > { %p1218_p3 = scmp.lt.s32.totalorder %s1216_s13, %s1212_s25 }
 0x3b2   : > { %p1214_p13 = pnand %p1213_p9, %p1558_p12 }
 0x3b3   : > { %p1219_p10 = por %p1218_p3, %p1217_p5 }
 0x3b4   : > { %p1215_p1 = pneg %p1214_p13 }
 0x3b6   : > { %p1220_p2 = pnand %p1219_p10, %p1215_p1 }
 0x3b8   : > { %1223 = shalt.err (!%p1220_p2)
}
 0x3b9   : > { %996 = dma.vmem_to_hbm [thread:$0]  (%p1558_p12), %s1497_s14, 128, %s707_s17, %s683_s18  }
 0x3ba PF: > { %p1022_p4 = scmp.ge.s32.totalorder %s1270_s24, 2  ;;  %s721_s15 = sand.u32 1, %s1258_s21  }
 0x3bb   : > { %p1560_p7 = scmp.ne.s32.totalorder %s1549_s8, 0  ;;  %s722_s9 = scalar_lea.sflag [#allocation4], %s721_s15 }
 0x3bd   : > { %p1010_p8 = pnand %p1022_p4, %p1560_p7 }
 0x3bf   : > { %p1011_p11 = pneg %p1010_p8 }
 0x3c1   : > { %1249 = dma.done.wait (%p1011_p11), %s722_s9, 128  }
 0x3c2   : > { %1251 = vsyncadd (%p1011_p11), %s722_s9, 4294967168  ;;  %s731_s12 = scalar_lea.sflag [#allocation10], %s721_s15 }
 0x3c3   : > { %1253 = dma.done.wait (%p1011_p11), %s731_s12, 128  }
 0x3c4   : > { %1255 = vsyncadd (%p1011_p11), %s731_s12, 4294967168  ;;  %p22_p12 = scmp.ge.s32.totalorder %s1343_s27, 4   ;;  %s1561_s21 = smov %s1262_s22 }
 0x3c5   : > { %s1562_s22 = smov %s1266_s23  ;;  %s1563_s23 = smov %s1354_s30 }
 0x3c6   : > { %s1564_s24 = smov %s1343_s27  ;;  %24 = sbr.rel (!%p22_p12) target bundleno = 7 (0x7), region = 108 }
 0x3cb   :  { %736 = vsyncpa [#allocation3], 1 }
 0x3cc   :  { %738 = vsyncpa [#allocation3 + $0x1], 1 }
 0x3cd   :  { %739 = vsyncpa [#allocation6], 1 }
 0x3ce   :  { %740 = vsyncpa [#allocation4], 1 }
 0x3cf   :  { %742 = vsyncpa [#allocation4 + $0x1], 1 }
 0x3d0   :  { %743 = vsyncpa [#allocation10], 1 }
 0x3d1   :  { %745 = vsyncpa [#allocation10 + $0x1], 1 }

</bundles_post_ra>
